<compile_context>
chip_gen: v7x
topology: tpu7x:2x2x1
jax: 0.10.0
libtpu: 0.0.40
codegen_flags: <defaults>
</compile_context>

<pallas_src>
import functools
import math

import jax
import jax.numpy as jnp
from jax import lax
from jax.experimental import pallas as pl
from jax.experimental.pallas import tpu as pltpu


# ----------------------------------------------------------------------------
# Kernel: full TransformerEncoderLayer + output head for a tile of Bt batch rows
# ----------------------------------------------------------------------------
def _encoder_kernel(
    x_ref,        # (Bt, L, D)  concat(seq_emb, target_emb)
    kmask_ref,    # (Bt, 1, L)  1.0 => padded position
    wq_ref, bq_ref,     # (D, D), (1, D)
    wk_ref, bk_ref,     # (D, D), (1, D)
    wv_ref, bv_ref,     # (D, D), (1, D)
    wo_ref, bo_ref,     # (D, D), (1, D)   attn out-proj
    g1_ref, be1_ref,    # (1, D), (1, D)   norm1
    w1_ref, b1_ref,     # (D, F), (1, F)   linear1
    w2_ref, b2_ref,     # (F, D), (1, D)   linear2
    g2_ref, be2_ref,    # (1, D), (1, D)   norm2
    wol_ref, bol_ref,   # (D, D), (1, D)   out_linear (max-pool head)
    o_top_ref,          # (Bt, K, D)  last-K rows of the masked transformer output
    o_pool_ref,         # (Bt, 1, D)  out_linear(masked max-pool)
    *,
    last_k,             # static K = min(first_k_cols, L)
):
    f32 = jnp.float32
    x3 = x_ref[...]                      # (Bt, L, D)
    Bt, L, D = x3.shape
    inv_d = 1.0 / D
    scale = 1.0 / math.sqrt(D)

    # Fold batch into the MXU M dimension for all dense layers.
    # (L is the sublane count here, so this reshape is layout-aligned.)
    x = x3.reshape(Bt * L, D)            # (Bt*L, D)
    km = kmask_ref[...]                  # (Bt, 1, L)

    # ---- self attention (nhead = 1) ----
    q = jnp.dot(x, wq_ref[...], preferred_element_type=f32) + bq_ref[...]
    k = jnp.dot(x, wk_ref[...], preferred_element_type=f32) + bk_ref[...]
    v = jnp.dot(x, wv_ref[...], preferred_element_type=f32) + bv_ref[...]
    q3 = q.reshape(Bt, L, D)
    k3 = k.reshape(Bt, L, D)
    v3 = v.reshape(Bt, L, D)

    scores = jnp.einsum("bld,bkd->blk", q3, k3,
                        preferred_element_type=f32) * scale        # (Bt, L, L)
    # mask padded keys (columns); large finite value avoids NaN even if a row
    # were ever fully masked (adjust_mask normally prevents that case).
    scores = jnp.where(km > 0.5, -1e30, scores)

    s_max = jnp.max(scores, axis=-1, keepdims=True)
    p = jnp.exp(scores - s_max)
    attn = p * pl.reciprocal(jnp.sum(p, axis=-1, keepdims=True), approx=True)

    ctx = jnp.einsum("blk,bkd->bld", attn, v3,
                     preferred_element_type=f32).reshape(Bt * L, D)
    attn_out = jnp.dot(ctx, wo_ref[...], preferred_element_type=f32) + bo_ref[...]

    # ---- residual + LayerNorm 1 ----
    x1 = x + attn_out
    mu1 = jnp.sum(x1, axis=-1, keepdims=True) * inv_d
    xc1 = x1 - mu1
    var1 = jnp.sum(xc1 * xc1, axis=-1, keepdims=True) * inv_d
    x1n = xc1 * lax.rsqrt(var1 + 1e-5) * g1_ref[...] + be1_ref[...]

    # ---- feed-forward (ReLU) ----
    h = jnp.maximum(
        jnp.dot(x1n, w1_ref[...], preferred_element_type=f32) + b1_ref[...], 0.0)
    ff = jnp.dot(h, w2_ref[...], preferred_element_type=f32) + b2_ref[...]

    # ---- residual + LayerNorm 2 ----
    x2 = x1n + ff
    mu2 = jnp.sum(x2, axis=-1, keepdims=True) * inv_d
    xc2 = x2 - mu2
    var2 = jnp.sum(xc2 * xc2, axis=-1, keepdims=True) * inv_d
    y3 = (xc2 * lax.rsqrt(var2 + 1e-5) * g2_ref[...] + be2_ref[...]).reshape(Bt, L, D)

    # ---- per-row padding mask (Bt, L, 1), derived from the key mask ----
    # diag-select then lane-reduce: row_m[b, i, 0] = km[b, 0, i]
    eye = (lax.broadcasted_iota(jnp.int32, (1, L, L), 1)
           == lax.broadcasted_iota(jnp.int32, (1, L, L), 2)).astype(f32)
    row_m = jnp.sum(km * eye, axis=-1, keepdims=True)              # (Bt, L, 1)
    pad_row = row_m > 0.5

    # ---- masked_fill(pad, 0) + write only the last-K rows ----
    tout = jnp.where(pad_row, 0.0, y3)                              # (Bt, L, D)
    o_top_ref[...] = tout[:, L - last_k:, :]

    # ---- masked max-pool (pad -> -1e9) via static tree-max over rows ----
    pool = jnp.where(pad_row, -1e9, tout)                           # (Bt, L, D)
    n = L
    while n > 1:
        half = n // 2
        if n % 2 == 0:
            pool = jnp.maximum(pool[:, :half, :], pool[:, half:, :])
        else:
            pool = jnp.concatenate(
                [jnp.maximum(pool[:, :half, :], pool[:, n - half:, :]),
                 pool[:, half:n - half, :]], axis=1)
        n -= half
    # pool: (Bt, 1, D)

    # out_linear on the pooled row (batched matmul keeps everything 3-D / canonical)
    wol_b = jnp.broadcast_to(wol_ref[...][None], (Bt, D, D))
    pooled_out = jnp.einsum("bkd,bde->bke", pool, wol_b,
                            preferred_element_type=f32) + bol_ref[...]
    o_pool_ref[...] = pooled_out


# ----------------------------------------------------------------------------
# Parameter init (deterministic, synthetic)
# ----------------------------------------------------------------------------
def init_params(key, d_model, dim_feedforward):
    ks = jax.random.split(key, 12)
    s = 0.05

    def nrm(k, shape):
        return s * jax.random.normal(k, shape, jnp.float32)

    D, F = d_model, dim_feedforward
    return {
        # attention (stored pre-transposed: [in, out])
        "wq": nrm(ks[0], (D, D)), "bq": nrm(ks[1], (1, D)),
        "wk": nrm(ks[2], (D, D)), "bk": nrm(ks[3], (1, D)),
        "wv": nrm(ks[4], (D, D)), "bv": nrm(ks[5], (1, D)),
        "wo": nrm(ks[6], (D, D)), "bo": nrm(ks[7], (1, D)),
        # layer norms
        "g1": jnp.ones((1, D), jnp.float32), "be1": jnp.zeros((1, D), jnp.float32),
        "g2": jnp.ones((1, D), jnp.float32), "be2": jnp.zeros((1, D), jnp.float32),
        # FFN
        "w1": nrm(ks[8], (D, F)), "b1": jnp.zeros((1, F), jnp.float32),
        "w2": nrm(ks[9], (F, D)), "b2": jnp.zeros((1, D), jnp.float32),
        # out_linear (concat_max_pool head)
        "wol": nrm(ks[10], (D, D)), "bol": nrm(ks[11], (1, D)),
    }


_PARAM_ORDER = ("wq", "bq", "wk", "bk", "wv", "bv", "wo", "bo",
                "g1", "be1", "w1", "b1", "w2", "b2", "g2", "be2",
                "wol", "bol")


def _pick_batch_tile(B, max_tile=32):
    """Largest batch tile <= max_tile that evenly divides B (whole batch if small)."""
    if B <= max_tile:
        return B
    for bt in range(max_tile, 0, -1):
        if B % bt == 0:
            return bt
    return B


# ----------------------------------------------------------------------------
# Forward wrapper (matches PyTorch Transformer.forward semantics)
# ----------------------------------------------------------------------------
@functools.partial(jax.jit, static_argnames=("first_k_cols",))
def transformer_forward(target_emb, sequence_emb, mask, params, first_k_cols=4):
    B, L, Es = sequence_emb.shape
    Et = target_emb.shape[-1]
    D = Es + Et
    K = min(first_k_cols, L)

    # concat([sequence_emb, target_emb.unsqueeze(1).expand(-1, L, -1)], dim=-1)
    concat = jnp.concatenate(
        [sequence_emb, jnp.broadcast_to(target_emb[:, None, :], (B, L, Et))],
        axis=-1,
    ).astype(jnp.float32)

    # adjust_mask: rows that are fully padded get their last position un-padded
    mb = mask.astype(bool)
    fully = jnp.all(mb, axis=-1)
    mb = mb.at[:, -1].set(jnp.where(fully, False, mb[:, -1]))
    kmask = mb.astype(jnp.float32)[:, None, :]          # (B, 1, L)

    Bt = _pick_batch_tile(B)
    grid = (B // Bt,)

    plist = [params[n] for n in _PARAM_ORDER]
    wspec = lambda a: pl.BlockSpec(a.shape, lambda b: (0, 0))

    in_specs = [
        pl.BlockSpec((Bt, L, D), lambda b: (b, 0, 0)),   # concat seq emb tile
        pl.BlockSpec((Bt, 1, L), lambda b: (b, 0, 0)),   # key-padding mask tile
    ] + [wspec(p) for p in plist]

    out_specs = [
        pl.BlockSpec((Bt, K, D), lambda b: (b, 0, 0)),   # last-K masked rows
        pl.BlockSpec((Bt, 1, D), lambda b: (b, 0, 0)),   # pooled head
    ]
    out_shapes = (
        jax.ShapeDtypeStruct((B, K, D), jnp.float32),
        jax.ShapeDtypeStruct((B, 1, D), jnp.float32),
    )

    o_top, o_pool = pl.pallas_call(
        functools.partial(_encoder_kernel, last_k=K),
        out_shape=out_shapes,
        grid_spec=pltpu.PrefetchScalarGridSpec(
            num_scalar_prefetch=0,
            grid=grid,
            in_specs=in_specs,
            out_specs=out_specs,
        ),
        compiler_params=pltpu.CompilerParams(
            dimension_semantics=("parallel",),   # lets v7x shard batch tiles over 2 TCs
        ),
    )(concat, kmask, *plist)

    last_k_flat = o_top.reshape(B, K * D)            # flatten(last-K rows)
    return jnp.concatenate([last_k_flat, o_pool[:, 0, :]], axis=-1)


# ----------------------------------------------------------------------------
if __name__ == "__main__":
    B = 2          # batch
    L = 8          # sequence length
    Es = 16        # sequence embedding dim
    Et = 16        # target embedding dim
    D = Es + Et    # transformer_in_dim = 32
    F = 64         # dim_feedforward
    K = 4          # first_k_cols

    key = jax.random.PRNGKey(0)
    k_t, k_s, k_m, k_p = jax.random.split(key, 4)

    target_emb = jax.random.normal(k_t, (B, Et), jnp.float32)
    sequence_emb = jax.random.normal(k_s, (B, L, Es), jnp.float32)
    # key padding mask: 1 => padded position; one fully-padded row exercises adjust_mask
    mask = (jax.random.uniform(k_m, (B, L)) > 0.6).astype(jnp.int32)
    mask = mask.at[1, :].set(1)

    params = init_params(k_p, D, F)

    out = transformer_forward(target_emb, sequence_emb, mask, params, first_k_cols=K)
    out = jax.block_until_ready(out)

    expected_dim = K * D + D
    assert out.shape == (B, expected_dim), out.shape
    assert bool(jnp.all(jnp.isfinite(out))), "non-finite output"
    print("KERNEL_OK")
</pallas_src>

<mosaic_0001>
module attributes {stable_mosaic.version = 11 : i64} {
  func.func @_encoder_kernel(%arg0: i32, %arg1: memref<2x8x32xf32, #tpu.memory_space<vmem>>, %arg2: memref<2x1x8xf32, #tpu.memory_space<vmem>>, %arg3: memref<32x32xf32, #tpu.memory_space<vmem>>, %arg4: memref<1x32xf32, #tpu.memory_space<vmem>>, %arg5: memref<32x32xf32, #tpu.memory_space<vmem>>, %arg6: memref<1x32xf32, #tpu.memory_space<vmem>>, %arg7: memref<32x32xf32, #tpu.memory_space<vmem>>, %arg8: memref<1x32xf32, #tpu.memory_space<vmem>>, %arg9: memref<32x32xf32, #tpu.memory_space<vmem>>, %arg10: memref<1x32xf32, #tpu.memory_space<vmem>>, %arg11: memref<1x32xf32, #tpu.memory_space<vmem>>, %arg12: memref<1x32xf32, #tpu.memory_space<vmem>>, %arg13: memref<32x64xf32, #tpu.memory_space<vmem>>, %arg14: memref<1x64xf32, #tpu.memory_space<vmem>>, %arg15: memref<64x32xf32, #tpu.memory_space<vmem>>, %arg16: memref<1x32xf32, #tpu.memory_space<vmem>>, %arg17: memref<1x32xf32, #tpu.memory_space<vmem>>, %arg18: memref<1x32xf32, #tpu.memory_space<vmem>>, %arg19: memref<32x32xf32, #tpu.memory_space<vmem>>, %arg20: memref<1x32xf32, #tpu.memory_space<vmem>>, %arg21: memref<2x4x32xf32, #tpu.memory_space<vmem>>, %arg22: memref<2x1x32xf32, #tpu.memory_space<vmem>>) attributes {dimension_semantics = [#tpu.dimension_semantics<parallel>], iteration_bounds = array<i64: 1>, scalar_prefetch = 0 : i64, scratch_operands = 0 : i64, tpu.core_type = #tpu.core_type<tc>, window_params = [{transform_indices = @transform_0, window_bounds = array<i64: 2, 8, 32>}, {transform_indices = @transform_1, window_bounds = array<i64: 2, 1, 8>}, {pipeline_mode = #tpu.pipeline_mode<synchronous>, transform_indices = @transform_2, window_bounds = array<i64: 32, 32>}, {pipeline_mode = #tpu.pipeline_mode<synchronous>, transform_indices = @transform_3, window_bounds = array<i64: 1, 32>}, {pipeline_mode = #tpu.pipeline_mode<synchronous>, transform_indices = @transform_4, window_bounds = array<i64: 32, 32>}, {pipeline_mode = #tpu.pipeline_mode<synchronous>, transform_indices = @transform_5, window_bounds = array<i64: 1, 32>}, {pipeline_mode = #tpu.pipeline_mode<synchronous>, transform_indices = @transform_6, window_bounds = array<i64: 32, 32>}, {pipeline_mode = #tpu.pipeline_mode<synchronous>, transform_indices = @transform_7, window_bounds = array<i64: 1, 32>}, {pipeline_mode = #tpu.pipeline_mode<synchronous>, transform_indices = @transform_8, window_bounds = array<i64: 32, 32>}, {pipeline_mode = #tpu.pipeline_mode<synchronous>, transform_indices = @transform_9, window_bounds = array<i64: 1, 32>}, {pipeline_mode = #tpu.pipeline_mode<synchronous>, transform_indices = @transform_10, window_bounds = array<i64: 1, 32>}, {pipeline_mode = #tpu.pipeline_mode<synchronous>, transform_indices = @transform_11, window_bounds = array<i64: 1, 32>}, {pipeline_mode = #tpu.pipeline_mode<synchronous>, transform_indices = @transform_12, window_bounds = array<i64: 32, 64>}, {pipeline_mode = #tpu.pipeline_mode<synchronous>, transform_indices = @transform_13, window_bounds = array<i64: 1, 64>}, {pipeline_mode = #tpu.pipeline_mode<synchronous>, transform_indices = @transform_14, window_bounds = array<i64: 64, 32>}, {pipeline_mode = #tpu.pipeline_mode<synchronous>, transform_indices = @transform_15, window_bounds = array<i64: 1, 32>}, {pipeline_mode = #tpu.pipeline_mode<synchronous>, transform_indices = @transform_16, window_bounds = array<i64: 1, 32>}, {pipeline_mode = #tpu.pipeline_mode<synchronous>, transform_indices = @transform_17, window_bounds = array<i64: 1, 32>}, {pipeline_mode = #tpu.pipeline_mode<synchronous>, transform_indices = @transform_18, window_bounds = array<i64: 32, 32>}, {pipeline_mode = #tpu.pipeline_mode<synchronous>, transform_indices = @transform_19, window_bounds = array<i64: 1, 32>}, {transform_indices = @transform_20, window_bounds = array<i64: 2, 4, 32>}, {transform_indices = @transform_21, window_bounds = array<i64: 2, 1, 32>}]} {
    %c0 = arith.constant 0 : index
    %c0_0 = arith.constant 0 : index
    %c0_1 = arith.constant 0 : index
    %0 = vector.load %arg1[%c0, %c0_0, %c0_1] : memref<2x8x32xf32, #tpu.memory_space<vmem>>, vector<2x8x32xf32>
    %1 = vector.shape_cast %0 : vector<2x8x32xf32> to vector<16x32xf32>
    %c0_2 = arith.constant 0 : index
    %c0_3 = arith.constant 0 : index
    %c0_4 = arith.constant 0 : index
    %2 = vector.load %arg2[%c0_2, %c0_3, %c0_4] : memref<2x1x8xf32, #tpu.memory_space<vmem>>, vector<2x1x8xf32>
    %c0_5 = arith.constant 0 : index
    %c0_6 = arith.constant 0 : index
    %3 = vector.load %arg3[%c0_5, %c0_6] : memref<32x32xf32, #tpu.memory_space<vmem>>, vector<32x32xf32>
    %cst = arith.constant dense<0.000000e+00> : vector<16x32xf32>
    %4 = tpu.matmul %1, %3, %cst {dimension_numbers = #tpu.dot_dimension_numbers<[1], [0], [0], [1], [0, 0, 1, 1], [], []>} : vector<16x32xf32>, vector<32x32xf32>, vector<16x32xf32> -> vector<16x32xf32>
    %c0_7 = arith.constant 0 : index
    %c0_8 = arith.constant 0 : index
    %5 = vector.load %arg4[%c0_7, %c0_8] : memref<1x32xf32, #tpu.memory_space<vmem>>, vector<1x32xf32>
    %6 = vector.broadcast %5 : vector<1x32xf32> to vector<16x32xf32>
    %7 = arith.addf %4, %6 : vector<16x32xf32>
    %c0_9 = arith.constant 0 : index
    %c0_10 = arith.constant 0 : index
    %8 = vector.load %arg5[%c0_9, %c0_10] : memref<32x32xf32, #tpu.memory_space<vmem>>, vector<32x32xf32>
    %cst_11 = arith.constant dense<0.000000e+00> : vector<16x32xf32>
    %9 = tpu.matmul %1, %8, %cst_11 {dimension_numbers = #tpu.dot_dimension_numbers<[1], [0], [0], [1], [0, 0, 1, 1], [], []>} : vector<16x32xf32>, vector<32x32xf32>, vector<16x32xf32> -> vector<16x32xf32>
    %c0_12 = arith.constant 0 : index
    %c0_13 = arith.constant 0 : index
    %10 = vector.load %arg6[%c0_12, %c0_13] : memref<1x32xf32, #tpu.memory_space<vmem>>, vector<1x32xf32>
    %11 = vector.broadcast %10 : vector<1x32xf32> to vector<16x32xf32>
    %12 = arith.addf %9, %11 : vector<16x32xf32>
    %c0_14 = arith.constant 0 : index
    %c0_15 = arith.constant 0 : index
    %13 = vector.load %arg7[%c0_14, %c0_15] : memref<32x32xf32, #tpu.memory_space<vmem>>, vector<32x32xf32>
    %cst_16 = arith.constant dense<0.000000e+00> : vector<16x32xf32>
    %14 = tpu.matmul %1, %13, %cst_16 {dimension_numbers = #tpu.dot_dimension_numbers<[1], [0], [0], [1], [0, 0, 1, 1], [], []>} : vector<16x32xf32>, vector<32x32xf32>, vector<16x32xf32> -> vector<16x32xf32>
    %c0_17 = arith.constant 0 : index
    %c0_18 = arith.constant 0 : index
    %15 = vector.load %arg8[%c0_17, %c0_18] : memref<1x32xf32, #tpu.memory_space<vmem>>, vector<1x32xf32>
    %16 = vector.broadcast %15 : vector<1x32xf32> to vector<16x32xf32>
    %17 = arith.addf %14, %16 : vector<16x32xf32>
    %18 = vector.shape_cast %7 : vector<16x32xf32> to vector<2x8x32xf32>
    %19 = vector.shape_cast %12 : vector<16x32xf32> to vector<2x8x32xf32>
    %20 = vector.shape_cast %17 : vector<16x32xf32> to vector<2x8x32xf32>
    "tpu.trace_start"() <{level = 10 : i32, message = "bld,bkd->blk"}> : () -> ()
    %cst_19 = arith.constant dense<0.000000e+00> : vector<2x8x8xf32>
    %21 = tpu.matmul %18, %19, %cst_19 {dimension_numbers = #tpu.dot_dimension_numbers<[2], [2], [1], [1], [0, 0, 0, 1, 1, 1], [0], [0]>} : vector<2x8x32xf32>, vector<2x8x32xf32>, vector<2x8x8xf32> -> vector<2x8x8xf32>
    "tpu.trace_stop"() : () -> ()
    %cst_20 = arith.constant 0.176776692 : f32
    %22 = vector.broadcast %cst_20 : f32 to vector<2x8x8xf32>
    %23 = arith.mulf %21, %22 : vector<2x8x8xf32>
    %cst_21 = arith.constant 5.000000e-01 : f32
    %24 = vector.broadcast %cst_21 : f32 to vector<2x1x8xf32>
    %25 = arith.cmpf ogt, %2, %24 : vector<2x1x8xf32>
    %cst_22 = arith.constant -1.000000e+30 : f32
    %26 = vector.shape_cast %25 : vector<2x1x8xi1> to vector<2x1x8xi1>
    %27 = vector.broadcast %26 : vector<2x1x8xi1> to vector<2x8x8xi1>
    %28 = vector.broadcast %cst_22 : f32 to vector<2x8x8xf32>
    %29 = arith.select %27, %28, %23 : vector<2x8x8xi1>, vector<2x8x8xf32>
    %cst_23 = arith.constant dense<0xFF800000> : vector<2x8xf32>
    %30 = vector.multi_reduction <maximumf>, %29, %cst_23 [2] : vector<2x8x8xf32> to vector<2x8xf32>
    %31 = vector.shape_cast %30 : vector<2x8xf32> to vector<2x8x1xf32>
    %32 = vector.broadcast %31 : vector<2x8x1xf32> to vector<2x8x8xf32>
    %33 = arith.subf %29, %32 : vector<2x8x8xf32>
    %34 = math.exp %33 : vector<2x8x8xf32>
    %cst_24 = arith.constant dense<0.000000e+00> : vector<2x8xf32>
    %35 = vector.multi_reduction <add>, %34, %cst_24 [2] : vector<2x8x8xf32> to vector<2x8xf32>
    %36 = vector.shape_cast %35 : vector<2x8xf32> to vector<2x8x1xf32>
    %37 = tpu.reciprocal %36 {approx = true} : vector<2x8x1xf32> -> vector<2x8x1xf32>
    %38 = vector.broadcast %37 : vector<2x8x1xf32> to vector<2x8x8xf32>
    %39 = arith.mulf %34, %38 : vector<2x8x8xf32>
    "tpu.trace_start"() <{level = 10 : i32, message = "blk,bkd->bld"}> : () -> ()
    %cst_25 = arith.constant dense<0.000000e+00> : vector<2x8x32xf32>
    %40 = tpu.matmul %39, %20, %cst_25 {dimension_numbers = #tpu.dot_dimension_numbers<[2], [1], [1], [2], [0, 0, 0, 1, 1, 2], [0], [0]>} : vector<2x8x8xf32>, vector<2x8x32xf32>, vector<2x8x32xf32> -> vector<2x8x32xf32>
    "tpu.trace_stop"() : () -> ()
    %41 = vector.shape_cast %40 : vector<2x8x32xf32> to vector<16x32xf32>
    %c0_26 = arith.constant 0 : index
    %c0_27 = arith.constant 0 : index
    %42 = vector.load %arg9[%c0_26, %c0_27] : memref<32x32xf32, #tpu.memory_space<vmem>>, vector<32x32xf32>
    %cst_28 = arith.constant dense<0.000000e+00> : vector<16x32xf32>
    %43 = tpu.matmul %41, %42, %cst_28 {dimension_numbers = #tpu.dot_dimension_numbers<[1], [0], [0], [1], [0, 0, 1, 1], [], []>} : vector<16x32xf32>, vector<32x32xf32>, vector<16x32xf32> -> vector<16x32xf32>
    %c0_29 = arith.constant 0 : index
    %c0_30 = arith.constant 0 : index
    %44 = vector.load %arg10[%c0_29, %c0_30] : memref<1x32xf32, #tpu.memory_space<vmem>>, vector<1x32xf32>
    %45 = vector.broadcast %44 : vector<1x32xf32> to vector<16x32xf32>
    %46 = arith.addf %43, %45 : vector<16x32xf32>
    %47 = arith.addf %1, %46 : vector<16x32xf32>
    %cst_31 = arith.constant dense<0.000000e+00> : vector<16xf32>
    %48 = vector.multi_reduction <add>, %47, %cst_31 [1] : vector<16x32xf32> to vector<16xf32>
    %49 = vector.shape_cast %48 : vector<16xf32> to vector<16x1xf32>
    %cst_32 = arith.constant 3.125000e-02 : f32
    %50 = vector.broadcast %cst_32 : f32 to vector<16x1xf32>
    %51 = arith.mulf %49, %50 : vector<16x1xf32>
    %52 = vector.broadcast %51 : vector<16x1xf32> to vector<16x32xf32>
    %53 = arith.subf %47, %52 : vector<16x32xf32>
    %54 = arith.mulf %53, %53 : vector<16x32xf32>
    %cst_33 = arith.constant dense<0.000000e+00> : vector<16xf32>
    %55 = vector.multi_reduction <add>, %54, %cst_33 [1] : vector<16x32xf32> to vector<16xf32>
    %56 = vector.shape_cast %55 : vector<16xf32> to vector<16x1xf32>
    %cst_34 = arith.constant 3.125000e-02 : f32
    %57 = vector.broadcast %cst_34 : f32 to vector<16x1xf32>
    %58 = arith.mulf %56, %57 : vector<16x1xf32>
    %cst_35 = arith.constant 9.99999974E-6 : f32
    %59 = vector.broadcast %cst_35 : f32 to vector<16x1xf32>
    %60 = arith.addf %58, %59 : vector<16x1xf32>
    %61 = math.rsqrt %60 : vector<16x1xf32>
    %62 = vector.broadcast %61 : vector<16x1xf32> to vector<16x32xf32>
    %63 = arith.mulf %53, %62 : vector<16x32xf32>
    %c0_36 = arith.constant 0 : index
    %c0_37 = arith.constant 0 : index
    %64 = vector.load %arg11[%c0_36, %c0_37] : memref<1x32xf32, #tpu.memory_space<vmem>>, vector<1x32xf32>
    %65 = vector.broadcast %64 : vector<1x32xf32> to vector<16x32xf32>
    %66 = arith.mulf %63, %65 : vector<16x32xf32>
    %c0_38 = arith.constant 0 : index
    %c0_39 = arith.constant 0 : index
    %67 = vector.load %arg12[%c0_38, %c0_39] : memref<1x32xf32, #tpu.memory_space<vmem>>, vector<1x32xf32>
    %68 = vector.broadcast %67 : vector<1x32xf32> to vector<16x32xf32>
    %69 = arith.addf %66, %68 : vector<16x32xf32>
    %c0_40 = arith.constant 0 : index
    %c0_41 = arith.constant 0 : index
    %70 = vector.load %arg13[%c0_40, %c0_41] : memref<32x64xf32, #tpu.memory_space<vmem>>, vector<32x64xf32>
    %cst_42 = arith.constant dense<0.000000e+00> : vector<16x64xf32>
    %71 = tpu.matmul %69, %70, %cst_42 {dimension_numbers = #tpu.dot_dimension_numbers<[1], [0], [0], [1], [0, 0, 1, 1], [], []>} : vector<16x32xf32>, vector<32x64xf32>, vector<16x64xf32> -> vector<16x64xf32>
    %c0_43 = arith.constant 0 : index
    %c0_44 = arith.constant 0 : index
    %72 = vector.load %arg14[%c0_43, %c0_44] : memref<1x64xf32, #tpu.memory_space<vmem>>, vector<1x64xf32>
    %73 = vector.broadcast %72 : vector<1x64xf32> to vector<16x64xf32>
    %74 = arith.addf %71, %73 : vector<16x64xf32>
    %cst_45 = arith.constant 0.000000e+00 : f32
    %75 = vector.broadcast %cst_45 : f32 to vector<16x64xf32>
    %76 = arith.maximumf %74, %75 : vector<16x64xf32>
    %c0_46 = arith.constant 0 : index
    %c0_47 = arith.constant 0 : index
    %77 = vector.load %arg15[%c0_46, %c0_47] : memref<64x32xf32, #tpu.memory_space<vmem>>, vector<64x32xf32>
    %cst_48 = arith.constant dense<0.000000e+00> : vector<16x32xf32>
    %78 = tpu.matmul %76, %77, %cst_48 {dimension_numbers = #tpu.dot_dimension_numbers<[1], [0], [0], [1], [0, 0, 1, 1], [], []>} : vector<16x64xf32>, vector<64x32xf32>, vector<16x32xf32> -> vector<16x32xf32>
    %c0_49 = arith.constant 0 : index
    %c0_50 = arith.constant 0 : index
    %79 = vector.load %arg16[%c0_49, %c0_50] : memref<1x32xf32, #tpu.memory_space<vmem>>, vector<1x32xf32>
    %80 = vector.broadcast %79 : vector<1x32xf32> to vector<16x32xf32>
    %81 = arith.addf %78, %80 : vector<16x32xf32>
    %82 = arith.addf %69, %81 : vector<16x32xf32>
    %cst_51 = arith.constant dense<0.000000e+00> : vector<16xf32>
    %83 = vector.multi_reduction <add>, %82, %cst_51 [1] : vector<16x32xf32> to vector<16xf32>
    %84 = vector.shape_cast %83 : vector<16xf32> to vector<16x1xf32>
    %cst_52 = arith.constant 3.125000e-02 : f32
    %85 = vector.broadcast %cst_52 : f32 to vector<16x1xf32>
    %86 = arith.mulf %84, %85 : vector<16x1xf32>
    %87 = vector.broadcast %86 : vector<16x1xf32> to vector<16x32xf32>
    %88 = arith.subf %82, %87 : vector<16x32xf32>
    %89 = arith.mulf %88, %88 : vector<16x32xf32>
    %cst_53 = arith.constant dense<0.000000e+00> : vector<16xf32>
    %90 = vector.multi_reduction <add>, %89, %cst_53 [1] : vector<16x32xf32> to vector<16xf32>
    %91 = vector.shape_cast %90 : vector<16xf32> to vector<16x1xf32>
    %cst_54 = arith.constant 3.125000e-02 : f32
    %92 = vector.broadcast %cst_54 : f32 to vector<16x1xf32>
    %93 = arith.mulf %91, %92 : vector<16x1xf32>
    %cst_55 = arith.constant 9.99999974E-6 : f32
    %94 = vector.broadcast %cst_55 : f32 to vector<16x1xf32>
    %95 = arith.addf %93, %94 : vector<16x1xf32>
    %96 = math.rsqrt %95 : vector<16x1xf32>
    %97 = vector.broadcast %96 : vector<16x1xf32> to vector<16x32xf32>
    %98 = arith.mulf %88, %97 : vector<16x32xf32>
    %c0_56 = arith.constant 0 : index
    %c0_57 = arith.constant 0 : index
    %99 = vector.load %arg17[%c0_56, %c0_57] : memref<1x32xf32, #tpu.memory_space<vmem>>, vector<1x32xf32>
    %100 = vector.broadcast %99 : vector<1x32xf32> to vector<16x32xf32>
    %101 = arith.mulf %98, %100 : vector<16x32xf32>
    %c0_58 = arith.constant 0 : index
    %c0_59 = arith.constant 0 : index
    %102 = vector.load %arg18[%c0_58, %c0_59] : memref<1x32xf32, #tpu.memory_space<vmem>>, vector<1x32xf32>
    %103 = vector.broadcast %102 : vector<1x32xf32> to vector<16x32xf32>
    %104 = arith.addf %101, %103 : vector<16x32xf32>
    %105 = vector.shape_cast %104 : vector<16x32xf32> to vector<2x8x32xf32>
    %106 = tpu.iota {dimensions = array<i32: 1>} : vector<1x8x8xi32>
    %107 = tpu.iota {dimensions = array<i32: 2>} : vector<1x8x8xi32>
    %108 = arith.cmpi eq, %106, %107 : vector<1x8x8xi32>
    %109 = arith.extui %108 : vector<1x8x8xi1> to vector<1x8x8xi32>
    %110 = arith.sitofp %109 : vector<1x8x8xi32> to vector<1x8x8xf32>
    %111 = vector.broadcast %2 : vector<2x1x8xf32> to vector<2x8x8xf32>
    %112 = vector.broadcast %110 : vector<1x8x8xf32> to vector<2x8x8xf32>
    %113 = arith.mulf %111, %112 : vector<2x8x8xf32>
    %cst_60 = arith.constant dense<0.000000e+00> : vector<2x8xf32>
    %114 = vector.multi_reduction <add>, %113, %cst_60 [2] : vector<2x8x8xf32> to vector<2x8xf32>
    %115 = vector.shape_cast %114 : vector<2x8xf32> to vector<2x8x1xf32>
    %cst_61 = arith.constant 5.000000e-01 : f32
    %116 = vector.broadcast %cst_61 : f32 to vector<2x8x1xf32>
    %117 = arith.cmpf ogt, %115, %116 : vector<2x8x1xf32>
    %cst_62 = arith.constant 0.000000e+00 : f32
    %118 = vector.shape_cast %117 : vector<2x8x1xi1> to vector<2x8x1xi1>
    %119 = vector.broadcast %118 : vector<2x8x1xi1> to vector<2x8x32xi1>
    %120 = vector.broadcast %cst_62 : f32 to vector<2x8x32xf32>
    %121 = arith.select %119, %120, %105 : vector<2x8x32xi1>, vector<2x8x32xf32>
    %122 = vector.extract_strided_slice %121 {offsets = [0, 4, 0], sizes = [2, 4, 32], strides = [1, 1, 1]} : vector<2x8x32xf32> to vector<2x4x32xf32>
    %c0_63 = arith.constant 0 : index
    %c0_64 = arith.constant 0 : index
    %c0_65 = arith.constant 0 : index
    %123 = vector.load %arg21[%c0_63, %c0_64, %c0_65] : memref<2x4x32xf32, #tpu.memory_space<vmem>>, vector<2x4x32xf32>
    tpu.vector_store %arg21[%c0_63, %c0_64, %c0_65], %122 {strides = array<i32>} : memref<2x4x32xf32, #tpu.memory_space<vmem>>, vector<2x4x32xf32>,
    %cst_66 = arith.constant -1.000000e+09 : f32
    %124 = vector.shape_cast %117 : vector<2x8x1xi1> to vector<2x8x1xi1>
    %125 = vector.broadcast %124 : vector<2x8x1xi1> to vector<2x8x32xi1>
    %126 = vector.broadcast %cst_66 : f32 to vector<2x8x32xf32>
    %127 = arith.select %125, %126, %121 : vector<2x8x32xi1>, vector<2x8x32xf32>
    %128 = vector.extract_strided_slice %127 {offsets = [0, 0, 0], sizes = [2, 4, 32], strides = [1, 1, 1]} : vector<2x8x32xf32> to vector<2x4x32xf32>
    %129 = vector.extract_strided_slice %127 {offsets = [0, 4, 0], sizes = [2, 4, 32], strides = [1, 1, 1]} : vector<2x8x32xf32> to vector<2x4x32xf32>
    %130 = arith.maximumf %128, %129 : vector<2x4x32xf32>
    %131 = vector.extract_strided_slice %130 {offsets = [0, 0, 0], sizes = [2, 2, 32], strides = [1, 1, 1]} : vector<2x4x32xf32> to vector<2x2x32xf32>
    %132 = vector.extract_strided_slice %130 {offsets = [0, 2, 0], sizes = [2, 2, 32], strides = [1, 1, 1]} : vector<2x4x32xf32> to vector<2x2x32xf32>
    %133 = arith.maximumf %131, %132 : vector<2x2x32xf32>
    %134 = vector.extract_strided_slice %133 {offsets = [0, 0, 0], sizes = [2, 1, 32], strides = [1, 1, 1]} : vector<2x2x32xf32> to vector<2x1x32xf32>
    %135 = vector.extract_strided_slice %133 {offsets = [0, 1, 0], sizes = [2, 1, 32], strides = [1, 1, 1]} : vector<2x2x32xf32> to vector<2x1x32xf32>
    %136 = arith.maximumf %134, %135 : vector<2x1x32xf32>
    %c0_67 = arith.constant 0 : index
    %c0_68 = arith.constant 0 : index
    %137 = vector.load %arg19[%c0_67, %c0_68] : memref<32x32xf32, #tpu.memory_space<vmem>>, vector<32x32xf32>
    %138 = vector.shape_cast %137 : vector<32x32xf32> to vector<1x32x32xf32>
    %139 = vector.shape_cast %138 : vector<1x32x32xf32> to vector<1x32x32xf32>
    %140 = vector.broadcast %139 : vector<1x32x32xf32> to vector<2x32x32xf32>
    "tpu.trace_start"() <{level = 10 : i32, message = "bkd,bde->bke"}> : () -> ()
    %cst_69 = arith.constant dense<0.000000e+00> : vector<2x1x32xf32>
    %141 = tpu.matmul %136, %140, %cst_69 {dimension_numbers = #tpu.dot_dimension_numbers<[2], [1], [1], [2], [0, 0, 0, 1, 1, 2], [0], [0]>} : vector<2x1x32xf32>, vector<2x32x32xf32>, vector<2x1x32xf32> -> vector<2x1x32xf32>
    "tpu.trace_stop"() : () -> ()
    %c0_70 = arith.constant 0 : index
    %c0_71 = arith.constant 0 : index
    %142 = vector.load %arg20[%c0_70, %c0_71] : memref<1x32xf32, #tpu.memory_space<vmem>>, vector<1x32xf32>
    %143 = vector.shape_cast %142 : vector<1x32xf32> to vector<1x1x32xf32>
    %144 = vector.broadcast %143 : vector<1x1x32xf32> to vector<2x1x32xf32>
    %145 = arith.addf %141, %144 : vector<2x1x32xf32>
    %c0_72 = arith.constant 0 : index
    %c0_73 = arith.constant 0 : index
    %c0_74 = arith.constant 0 : index
    %146 = vector.load %arg22[%c0_72, %c0_73, %c0_74] : memref<2x1x32xf32, #tpu.memory_space<vmem>>, vector<2x1x32xf32>
    tpu.vector_store %arg22[%c0_72, %c0_73, %c0_74], %145 {strides = array<i32>} : memref<2x1x32xf32, #tpu.memory_space<vmem>>, vector<2x1x32xf32>,
    return
  }
  func.func @transform_0(%arg0: i32) -> (i32, i32, i32) {
    %c0_i32 = arith.constant 0 : i32
    %c0_i32_0 = arith.constant 0 : i32
    %c0_i32_1 = arith.constant 0 : i32
    return %arg0, %c0_i32, %c0_i32_0 : i32, i32, i32
  }
  func.func @transform_1(%arg0: i32) -> (i32, i32, i32) {
    %c0_i32 = arith.constant 0 : i32
    %c0_i32_0 = arith.constant 0 : i32
    %c0_i32_1 = arith.constant 0 : i32
    return %arg0, %c0_i32, %c0_i32_0 : i32, i32, i32
  }
  func.func @transform_2(%arg0: i32) -> (i32, i32) {
    %c0_i32 = arith.constant 0 : i32
    %c0_i32_0 = arith.constant 0 : i32
    %c0_i32_1 = arith.constant 0 : i32
    return %c0_i32, %c0_i32_0 : i32, i32
  }
  func.func @transform_3(%arg0: i32) -> (i32, i32) {
    %c0_i32 = arith.constant 0 : i32
    %c0_i32_0 = arith.constant 0 : i32
    %c0_i32_1 = arith.constant 0 : i32
    return %c0_i32, %c0_i32_0 : i32, i32
  }
  func.func @transform_4(%arg0: i32) -> (i32, i32) {
    %c0_i32 = arith.constant 0 : i32
    %c0_i32_0 = arith.constant 0 : i32
    %c0_i32_1 = arith.constant 0 : i32
    return %c0_i32, %c0_i32_0 : i32, i32
  }
  func.func @transform_5(%arg0: i32) -> (i32, i32) {
    %c0_i32 = arith.constant 0 : i32
    %c0_i32_0 = arith.constant 0 : i32
    %c0_i32_1 = arith.constant 0 : i32
    return %c0_i32, %c0_i32_0 : i32, i32
  }
  func.func @transform_6(%arg0: i32) -> (i32, i32) {
    %c0_i32 = arith.constant 0 : i32
    %c0_i32_0 = arith.constant 0 : i32
    %c0_i32_1 = arith.constant 0 : i32
    return %c0_i32, %c0_i32_0 : i32, i32
  }
  func.func @transform_7(%arg0: i32) -> (i32, i32) {
    %c0_i32 = arith.constant 0 : i32
    %c0_i32_0 = arith.constant 0 : i32
    %c0_i32_1 = arith.constant 0 : i32
    return %c0_i32, %c0_i32_0 : i32, i32
  }
  func.func @transform_8(%arg0: i32) -> (i32, i32) {
    %c0_i32 = arith.constant 0 : i32
    %c0_i32_0 = arith.constant 0 : i32
    %c0_i32_1 = arith.constant 0 : i32
    return %c0_i32, %c0_i32_0 : i32, i32
  }
  func.func @transform_9(%arg0: i32) -> (i32, i32) {
    %c0_i32 = arith.constant 0 : i32
    %c0_i32_0 = arith.constant 0 : i32
    %c0_i32_1 = arith.constant 0 : i32
    return %c0_i32, %c0_i32_0 : i32, i32
  }
  func.func @transform_10(%arg0: i32) -> (i32, i32) {
    %c0_i32 = arith.constant 0 : i32
    %c0_i32_0 = arith.constant 0 : i32
    %c0_i32_1 = arith.constant 0 : i32
    return %c0_i32, %c0_i32_0 : i32, i32
  }
  func.func @transform_11(%arg0: i32) -> (i32, i32) {
    %c0_i32 = arith.constant 0 : i32
    %c0_i32_0 = arith.constant 0 : i32
    %c0_i32_1 = arith.constant 0 : i32
    return %c0_i32, %c0_i32_0 : i32, i32
  }
  func.func @transform_12(%arg0: i32) -> (i32, i32) {
    %c0_i32 = arith.constant 0 : i32
    %c0_i32_0 = arith.constant 0 : i32
    %c0_i32_1 = arith.constant 0 : i32
    return %c0_i32, %c0_i32_0 : i32, i32
  }
  func.func @transform_13(%arg0: i32) -> (i32, i32) {
    %c0_i32 = arith.constant 0 : i32
    %c0_i32_0 = arith.constant 0 : i32
    %c0_i32_1 = arith.constant 0 : i32
    return %c0_i32, %c0_i32_0 : i32, i32
  }
  func.func @transform_14(%arg0: i32) -> (i32, i32) {
    %c0_i32 = arith.constant 0 : i32
    %c0_i32_0 = arith.constant 0 : i32
    %c0_i32_1 = arith.constant 0 : i32
    return %c0_i32, %c0_i32_0 : i32, i32
  }
  func.func @transform_15(%arg0: i32) -> (i32, i32) {
    %c0_i32 = arith.constant 0 : i32
    %c0_i32_0 = arith.constant 0 : i32
    %c0_i32_1 = arith.constant 0 : i32
    return %c0_i32, %c0_i32_0 : i32, i32
  }
  func.func @transform_16(%arg0: i32) -> (i32, i32) {
    %c0_i32 = arith.constant 0 : i32
    %c0_i32_0 = arith.constant 0 : i32
    %c0_i32_1 = arith.constant 0 : i32
    return %c0_i32, %c0_i32_0 : i32, i32
  }
  func.func @transform_17(%arg0: i32) -> (i32, i32) {
    %c0_i32 = arith.constant 0 : i32
    %c0_i32_0 = arith.constant 0 : i32
    %c0_i32_1 = arith.constant 0 : i32
    return %c0_i32, %c0_i32_0 : i32, i32
  }
  func.func @transform_18(%arg0: i32) -> (i32, i32) {
    %c0_i32 = arith.constant 0 : i32
    %c0_i32_0 = arith.constant 0 : i32
    %c0_i32_1 = arith.constant 0 : i32
    return %c0_i32, %c0_i32_0 : i32, i32
  }
  func.func @transform_19(%arg0: i32) -> (i32, i32) {
    %c0_i32 = arith.constant 0 : i32
    %c0_i32_0 = arith.constant 0 : i32
    %c0_i32_1 = arith.constant 0 : i32
    return %c0_i32, %c0_i32_0 : i32, i32
  }
  func.func @transform_20(%arg0: i32) -> (i32, i32, i32) {
    %c0_i32 = arith.constant 0 : i32
    %c0_i32_0 = arith.constant 0 : i32
    %c0_i32_1 = arith.constant 0 : i32
    return %arg0, %c0_i32, %c0_i32_0 : i32, i32, i32
  }
  func.func @transform_21(%arg0: i32) -> (i32, i32, i32) {
    %c0_i32 = arith.constant 0 : i32
    %c0_i32_0 = arith.constant 0 : i32
    %c0_i32_1 = arith.constant 0 : i32
    return %arg0, %c0_i32, %c0_i32_0 : i32, i32, i32
  }
}

</mosaic_0001>

<bundles_post_ra>
// kernel: transformer_forward.1
= control target key start
LH: loop header
LB: loop body
LE: loop exit
PB: predicated region body
PF: predicated region fallthrough
CT: control target
= control target key end

     0   :  { %s1965_s0 = inlined_call_operand.vmem [shape: f32[2,8,32], index: 0, kind: input, shape index: {}]   ;;  %s1966_s1 = inlined_call_operand.vmem [shape: f32[2,1,8], index: 1, kind: input, shape index: {}]   ;;  %s1967_s2 = inlined_call_operand.vmem [shape: f32[32,32], index: 2, kind: input, shape index: {}]   ;;  %s1968_s3 = inlined_call_operand.vmem [shape: f32[1,32], index: 3, kind: input, shape index: {}]   ;;  %s1969_s4 = inlined_call_operand.vmem [shape: f32[32,32], index: 4, kind: input, shape index: {}]   ;;  %s1970_s5 = inlined_call_operand.vmem [shape: f32[1,32], index: 5, kind: input, shape index: {}]   ;;  %s1971_s6 = inlined_call_operand.vmem [shape: f32[32,32], index: 6, kind: input, shape index: {}]   ;;  %s1972_s7 = inlined_call_operand.vmem [shape: f32[1,32], index: 7, kind: input, shape index: {}]   ;;  %s1973_s8 = inlined_call_operand.vmem [shape: f32[32,32], index: 8, kind: input, shape index: {}]   ;;  %s1974_s9 = inlined_call_operand.vmem [shape: f32[1,32], index: 9, kind: input, shape index: {}]   ;;  %s1975_s10 = inlined_call_operand.vmem [shape: f32[1,32], index: 10, kind: input, shape index: {}]   ;;  %s1976_s11 = inlined_call_operand.vmem [shape: f32[1,32], index: 11, kind: input, shape index: {}]   ;;  %s1977_s12 = inlined_call_operand.vmem [shape: f32[32,64], index: 12, kind: input, shape index: {}]   ;;  %s1978_s13 = inlined_call_operand.hbm [shape: f32[1,64], index: 13, kind: input, shape index: {}]   ;;  %s1979_s14 = inlined_call_operand.vmem [shape: f32[64,32], index: 14, kind: input, shape index: {}]   ;;  %s1980_s15 = inlined_call_operand.vmem [shape: f32[1,32], index: 15, kind: input, shape index: {}]   ;;  %s1981_s16 = inlined_call_operand.vmem [shape: f32[1,32], index: 16, kind: input, shape index: {}]   ;;  %s1982_s17 = inlined_call_operand.vmem [shape: f32[1,32], index: 17, kind: input, shape index: {}]   ;;  %s1983_s18 = inlined_call_operand.vmem [shape: f32[32,32], index: 18, kind: input, shape index: {}]   ;;  %s1984_s19 = inlined_call_operand.vmem [shape: f32[1,32], index: 19, kind: input, shape index: {}]   ;;  %s1985_s20 = inlined_call_operand.vmem [shape: f32[2,4,32], index: 20, kind: output, shape index: {0}]   ;;  %s1986_s21 = inlined_call_operand.vmem [shape: f32[2,1,32], index: 21, kind: output, shape index: {1}]  }
   0x1   :  { %1991 = sst [smem:[#allocation5_spill]] %s1965_s0 }
   0x2   :  { %1992 = sst [smem:[#allocation6_spill]] %s1966_s1 }
   0x3   :  { %1993 = sst [smem:[#allocation7_spill]] %s1967_s2 }
   0x4   :  { %1994 = sst [smem:[#allocation8_spill]] %s1968_s3 }
   0x5   :  { %1995 = sst [smem:[#allocation9_spill]] %s1969_s4 }
   0x6   :  { %1996 = sst [smem:[#allocation10_spill]] %s1970_s5 }
   0x7   :  { %27 = vsyncpa [#allocation3], 0  ;;  %s1607_s2 = smov [#allocation2]   ;;  %s1583_s3 = scalar_lea.hbm %s1978_s13, 16 }
   0x8   :  { %s60_s25 = sshll.u32 %s1607_s2, 4  ;;  %p1584_p0 = scmp.ne.s32.totalorder %s1978_s13, %s1583_s3  ;;  %s61_s25 = int_to_ptr.vmem [resolvable:$true] %s60_s25 }
   0x9   :  { %p1587_p1 = scmp.lt.u32.totalorder %s1583_s3, %s1978_s13 }
   0xb   :  { %p1589_p2 = pnand %p1587_p1, %p1584_p0 }
   0xd   :  { %1592 = shalt.err (!%p1589_p2)
}
   0xe   :  { %s1593_s30 = scalar_lea.vmem %s61_s25, 16  ;;  %s1597_s5 = scalar_lea.vmem %s61_s25, 32 }
   0xf   :  { %p1594_p3 = scmp.ne.s32.totalorder %s61_s25, %s1593_s30  ;;  %p1598_p4 = scmp.lt.s32.totalorder %s61_s25, %s61_s25 }
  0x10   :  { %p1599_p5 = scmp.lt.s32.totalorder %s1597_s5, %s1593_s30 }
  0x12   :  { %p1600_p6 = por %p1599_p5, %p1598_p4 }
  0x14   :  { %p1601_p7 = pnand %p1600_p6, %p1594_p3 }
  0x16   :  { %1604 = shalt.err (!%p1601_p7)
}
  0x17   :  { %63 = dma.hbm_to_vmem [thread:$0]  %s1978_s13, 16, %s61_s25, [#allocation3]  }
  0x18   :  { %1605 = dma.done.wait [#allocation3], 16  }
  0x19   :  { %1606 = vsyncadd [#allocation3], 4294967280  ;;  %s1997_s2 = sld [smem:[#allocation9_spill]]  ;;  %s1998_s29 = sld [smem:[#allocation7_spill]]  ;;  %vm94_vm0 = vcmask 261120   ;;  %v1608_v14 = vmov 0.0   ;;  %v506_v31 = vlaneseq }
  0x1a   :  { %s1999_s3 = sld [smem:[#allocation5_spill]]  ;;  %vm1609_vm1 = vmmov 0   ;;  %s2000_s4 = sld [smem:[#allocation10_spill]]  ;;  %v262_v25 = vld [vmem:[%s1971_s6] sm:$0xff]  ;;  %v263_v26 = vld [vmem:[%s1971_s6 + $0x8] sm:$0xff]  ;;  %v264_v27 = vld [vmem:[%s1971_s6 + $0x10] sm:$0xff] }
  0x1b   :  { %s2001_s30 = sld [smem:[#allocation8_spill]]  ;;  %v1510_v28 = vpack.c.bf16 %v263_v26, %v262_v25  ;;  %v265_v29 = vld [vmem:[%s1971_s6 + $0x18] sm:$0xff]  ;;  %v1820_v33 = vshrl.u32 %v506_v31, 7  ;;  %v1610_v36 = vmov 0   ;;  %vm518_vm5 = vcmask 64512  }
  0x1c   :  { %v1514_v30 = vpack.c.bf16 %v265_v29, %v264_v27  ;;  %v1295_v62 = vld [vmem:[%s1972_s7] ss:$0 sm:$0xff]  ;;  %vm934_vm7 = vcmask 523264   ;;  %vm1097_vm10 = vcmask 261124   ;;  %vm1277_vm12 = vcmask 253952  }
  0x1d   :  { %v1829_v35 = vsub.s32 0, %v1820_v33 }
  0x1f   :  { %v176_v0 = vld [vmem:[%s1997_s2] sm:$0xff]  ;;  %v177_v1 = vld [vmem:[%s1997_s2 + $0x8] sm:$0xff]  ;;  %v178_v5 = vld [vmem:[%s1997_s2 + $0x10] sm:$0xff] }
  0x20   :  { %v83_v2 = vld [vmem:[%s1998_s29] sm:$0xff]  ;;  %v1502_v3 = vpack.c.bf16 %v177_v1, %v176_v0  ;;  %v84_v4 = vld [vmem:[%s1998_s29 + $0x8] sm:$0xff]  ;;  %v179_v6 = vld [vmem:[%s1997_s2 + $0x18] sm:$0xff] }
  0x21   :  { %v1494_v7 = vpack.c.bf16 %v84_v4, %v83_v2  ;;  %v1506_v8 = vpack.c.bf16 %v179_v6, %v178_v5  ;;  %v85_v9 = vld [vmem:[%s1998_s29 + $0x10] sm:$0xff]  ;;  %v86_v10 = vld [vmem:[%s1998_s29 + $0x18] sm:$0xff]  ;;  %v1761_v11 = vld [vmem:[%s1999_s3] sm:$0xff]  ;;  %s2002_s29 = sld [smem:[#allocation6_spill]] }
  0x22   :  { %1503 = vmatprep.subr.bf16.mxu1 %v1502_v3  ;;  %v1498_v12 = vpack.c.bf16 %v86_v10, %v85_v9  ;;  %1397 = vmatprep.mubr.msk.f32.mxu1 %vm94_vm0, %v1761_v11  ;;  %v1770_v13 = vld [vmem:[%s1999_s3 + $0x8] sm:$0xff]  ;;  %v1292_v15 = vld [vmem:[%s2000_s4] ss:$0 sm:$0xff] }
  0x23   :  { %1505 = vmatpush3.bf16.msra.mxu1 %v1502_v3  ;;  %1495 = vmatprep.subr.bf16.mxu0 %v1494_v7  ;;  %v1289_v17 = vld [vmem:[%s2001_s30] ss:$0 sm:$0xff]  ;;  %v688_v3 = vld [vmem:[%s1973_s8 + $0x8] sm:$0xff] }
  0x24   :  { %1497 = vmatpush3.bf16.msra.mxu0 %v1494_v7  ;;  %1507 = vmatprep.subr.bf16.mxu1 %v1506_v8  ;;  %v687_v2 = vld [vmem:[%s1973_s8] sm:$0xff] }
  0x25   :  { %1499 = vmatprep.subr.bf16.mxu0 %v1498_v12  ;;  %1386 = vmatprep.mubr.msk.f32.mxu0 %vm94_vm0, %v1761_v11  ;;  %v1518_v4 = vpack.c.bf16 %v688_v3, %v687_v2 }
  0x27   :  { %1509 = vmatpush3.bf16.msra.mxu1 %v1506_v8  ;;  %v1817_v32 = vld [vmem:[%s2002_s29] sm:$0x1]  ;;  %v1826_v34 = vld [vmem:[%s2002_s29 + $0x1] sm:$0x1] }
  0x28   :  { %1501 = vmatpush3.bf16.msra.mxu0 %v1498_v12  ;;  %1411 = vmatprep.subr.mxu1 %v1608_v14  ;;  %vm502_vm2 = vcmp.gt.f32.partialorder %v1817_v32, 0.5  ;;  %vm503_vm3 = vcmp.gt.f32.partialorder %v1826_v34, 0.5  ;;  %v689_v12 = vld [vmem:[%s1973_s8 + $0x10] sm:$0xff] }
  0x29   :  { %1511 = vmatprep.subr.bf16.mxu0 %v1510_v28  ;;  %v504_v37 = vsel %vm502_vm2, 1, %v1610_v36  ;;  %v505_v39 = vsel %vm503_vm3, 1, %v1610_v36 }
  0x2a   :  { %1398 = vmatmul.mubr.msk.f32.vlgmr.msra.gmra.mrb[0].mxu1 %vm94_vm0, %v1770_v13  ;;  %v509_v38 = vrot.slane %v504_v37, %v1829_v35  ;;  %v513_v41 = vrot.slane %v505_v39, %v1829_v35 }
  0x2b   :  { %1387 = vmatmul.mubr.msk.f32.vlgmr.msra.gmra.mrb[0].mxu0 %vm94_vm0, %v1770_v13  ;;  %1413 = vmatprep.mubr.msk.f32.mxu1 %vm1609_vm1, %v1608_v14 }
  0x2c   :  { %1408 = vmatprep.mubr.msk.f32.mxu0 %vm94_vm0, %v1761_v11  ;;  %1513 = vmatpush3.bf16.msra.mxu0 %v1510_v28  ;;  %vm514_vm4 = vcmp.eq.s32.totalorder %v509_v38, 1  ;;  %vm515_vm6 = vcmp.eq.s32.totalorder %v513_v41, 1 }
  0x2d   :  { %1515 = vmatprep.subr.bf16.mxu0 %v1514_v30 }
  0x30   :  { %1517 = vmatpush3.bf16.msra.mxu0 %v1514_v30 }
  0x31   :  { %1421 = vmatprep.subr.mxu0 %v1608_v14 }
  0x33   :  { %1409 = vmatmul.mubr.msk.f32.vlgmr.msra.gmra.mrb[2].mxu0 %vm94_vm0, %v1770_v13 }
  0x34   :  { %1423 = vmatprep.mubr.msk.f32.mxu0 %vm1609_vm1, %v1608_v14 }
  0xfd   :  { %v1399_v16 = vpop.f32.mrb[0].mxu1 }
  0xfe   :  { %v253_v18 = vpop.f32.mrb[1].mxu1  ;;  %v1388_v19 = vpop.f32.mrb[0].mxu0  ;;  %v259_v23 = vadd.f32 %v1399_v16, %v1292_v15 }
  0xff   :  { %v254_v20 = vadd.f32 %v1292_v15, %v253_v18  ;;  %v167_v21 = vpop.f32.mrb[1].mxu0  ;;  %v173_v24 = vadd.f32 %v1388_v19, %v1289_v17  ;;  %v690_v15 = vld [vmem:[%s1973_s8 + $0x18] sm:$0xff] }
 0x100   :  { %v168_v22 = vadd.f32 %v1289_v17, %v167_v21  ;;  %v1522_v16 = vpack.c.bf16 %v690_v15, %v689_v12  ;;  %v1304_v21 = vld [vmem:[%s1974_s9] ss:$0 sm:$0xff]  ;;  %v926_v12 = vld [vmem:[%s1979_s14 + $0x38] sm:$0xff] }
 0x101   :  { %1412 = vmatpush3.xpose.msk.msra.mxu1 %vm94_vm0, %v254_v20 }
 0x102   :  { %1416 = vmatprep.subr.mxu1 %v1608_v14 }
 0x104   :  { %1414 = vmatmul.mubr.msk.f32.vlgmr.msra.gmra.mrb[2].mxu1 %vm94_vm0, %v168_v22 }
 0x105   :  { %1417 = vmatpush3.xpose.msk.msra.mxu1 %vm94_vm0, %v259_v23  ;;  %1418 = vmatprep.mubr.msk.f32.mxu1 %vm1609_vm1, %v1608_v14 }
 0x106   :  { %1426 = vmatprep.subr.mxu1 %v1608_v14  ;;  %v1410_v61 = vpop.f32.mrb[2].mxu0 }
 0x107   :  { %v339_v63 = vpop.f32.mrb[3].mxu0  ;;  %v345_v1 = vadd.f32 %v1410_v61, %v1295_v62 }
 0x108   :  { %1419 = vmatmul.mubr.msk.f32.vlgmr.msra.gmra.mrb[4].mxu1 %vm94_vm0, %v173_v24  ;;  %v340_v0 = vadd.f32 %v1295_v62, %v339_v63 }
 0x109   :  { %1428 = vmatprep.mubr.msk.f32.mxu1 %vm1609_vm1, %v1608_v14  ;;  %1427 = vmatpush3.msra.mxu1 %v345_v1  ;;  %v1307_v1 = vld [vmem:[%s1975_s10] ss:$0 sm:$0xff] }
 0x10a   :  { %1422 = vmatpush3.msra.mxu0 %v340_v0 }
 0x10b   :  { %1519 = vmatprep.subr.bf16.mxu0 %v1518_v4 }
 0x1d7   :  { %v420_v40 = vpop.f32.mrb[2].mxu1 }
 0x1d8   :  { %v500_v42 = vmul.f32 0.17677669, %v420_v40  ;;  %v1415_v43 = vpop.f32.mrb[3].mxu1 }
 0x1da   :  { %v516_v44 = vsel %vm514_vm4, -1e+30, %v500_v42 }
 0x1db   :  { %v496_v45 = vpop.f32.mrb[4].mxu1  ;;  %v519_v46 = vsel %vm518_vm5, %v516_v44, -inf }
 0x1dc   :  { %v501_v47 = vmul.f32 0.17677669, %v496_v45  ;;  %520 = vmax.xlane.f32.xlu0 %v519_v46  ;;  %v1420_v48 = vpop.f32.mrb[5].mxu1  ;;  %v827_v46 = vld [vmem:[%s1977_s12 + $0x10] sm:$0xff] }
 0x1de   :  { %v517_v49 = vsel %vm515_vm6, -1e+30, %v501_v47  ;;  %v828_v47 = vld [vmem:[%s1977_s12 + $0x18] sm:$0xff] }
 0x1df   :  { %v522_v50 = vsel %vm518_vm5, %v517_v49, -inf  ;;  %v1530_v48 = vpack.c.bf16 %v828_v47, %v827_v46 }
 0x1e0   :  { %523 = vmax.xlane.f32.xlu0 %v522_v50  ;;  %v920_v50 = vld [vmem:[%s1979_s14 + $0x8] sm:$0xff] }
 0x269   :  { %v521_v51 = vpop.xlane.xlu0 %520 }
 0x26a   :  { %v525_v52 = vsub.f32 %v516_v44, %v521_v51  ;;  %v826_v44 = vld [vmem:[%s1977_s12 + $0x8] sm:$0xff]  ;;  %v921_v51 = vld [vmem:[%s1979_s14 + $0x10] sm:$0xff] }
 0x26c   :  { %v527_v53 = vmul.f32 1.442695, %v525_v52 }
 0x26d   :  { %v524_v54 = vpop.xlane.xlu0 %523 }
 0x26e   :  { %1567 = vpow2.f32 %v527_v53  ;;  %v526_v55 = vsub.f32 %v517_v49, %v524_v54  ;;  %v919_v49 = vld [vmem:[%s1979_s14] sm:$0xff]  ;;  %v922_v53 = vld [vmem:[%s1979_s14 + $0x18] sm:$0xff] }
 0x26f   :  { %v1534_v52 = vpack.c.bf16 %v920_v50, %v919_v49  ;;  %v1538_v54 = vpack.c.bf16 %v922_v53, %v921_v51  ;;  %v1611_v51 = vmov 0.0|0.0   ;;  %v1129_v53 = vld [vmem:[%s1983_s18 + $0x18] sm:$0xff] }
 0x270   :  { %v529_v56 = vmul.f32 1.442695, %v526_v55  ;;  %v923_v55 = vld [vmem:[%s1979_s14 + $0x20] sm:$0xff] }
 0x272   :  { %1569 = vpow2.f32 %v529_v56  ;;  %v924_v56 = vld [vmem:[%s1979_s14 + $0x28] sm:$0xff] }
 0x278   :  { %v1568_v57 = vpop.eup %1567 }
 0x279   :  { %v531_v58 = vsel %vm518_vm5, %v1568_v57, 0.0 }
 0x27a   :  { %532 = vadd.xlane.f32.xlu1 %v531_v58 }
 0x27c   :  { %v1570_v59 = vpop.eup %1569 }
 0x27d   :  { %v534_v60 = vsel %vm518_vm5, %v1570_v59, 0.0 }
 0x27e   :  { %535 = vadd.xlane.f32.xlu1 %v534_v60 }
 0x307   :  { %v533_v5 = vpop.xlane.xlu1 %532 }
 0x308   :  { %1571 = vrcp.f32 %v533_v5 }
 0x30b   :  { %v536_v6 = vpop.xlane.xlu1 %535 }
 0x30c   :  { %1573 = vrcp.f32 %v536_v6  ;;  %v1308_v6 = vld [vmem:[%s1976_s11] ss:$0 sm:$0xff] }
 0x312   :  { %v1572_v7 = vpop.eup %1571 }
 0x313   :  { %v539_v8 = vmul.f32 %v1572_v7, %v1568_v57  ;;  %v1542_v57 = vpack.c.bf16 %v924_v56, %v923_v55 }
 0x315   :  { %1424 = vmatmul.mubr.msk.f32.vlgmr.msra.gmra.mrb[4].mxu0 %vm518_vm5, %v539_v8 }
 0x316   :  { %v1574_v9 = vpop.eup %1573  ;;  %1521 = vmatpush3.bf16.msra.mxu0 %v1518_v4 }
 0x317   :  { %v540_v10 = vmul.f32 %v1574_v9, %v1570_v59  ;;  %1523 = vmatprep.subr.bf16.mxu0 %v1522_v16 }
 0x319   :  { %1429 = vmatmul.mubr.msk.f32.vlgmr.msra.gmra.mrb[6].mxu1 %vm518_vm5, %v540_v10  ;;  %v925_v10 = vld [vmem:[%s1979_s14 + $0x30] sm:$0xff] }
 0x31a   :  { %1525 = vmatpush3.bf16.msra.mxu0 %v1522_v16  ;;  %v1546_v15 = vpack.c.bf16 %v926_v12, %v925_v10  ;;  %v1309_v16 = vld [vmem:[#allocation2] ss:$0 sm:$0xff] }
 0x31b   :  { %1535 = vmatprep.subr.bf16.mxu0 %v1534_v52 }
 0x3e8   :  { %v610_v17 = vpop.f32.mrb[4].mxu0 }
 0x3e9   :  { %v1425_v18 = vpop.f32.mrb[5].mxu0  ;;  %1439 = vmatprep.mubr.msk.f32.mxu0 %vm94_vm0, %v610_v17 }
 0x3ec   :  { %v683_v19 = vpop.f32.mrb[6].mxu1 }
 0x3ed   :  { %v1430_v20 = vpop.f32.mrb[7].mxu1  ;;  %1440 = vmatmul.mubr.msk.f32.vlgmr.msra.gmra.mrb[6].mxu0 %vm94_vm0, %v683_v19 }
 0x3ee   :  { %1537 = vmatpush3.bf16.msra.mxu0 %v1534_v52  ;;  %v1128_v52 = vld [vmem:[%s1983_s18 + $0x10] sm:$0xff] }
 0x3ef   :  { %1539 = vmatprep.subr.bf16.mxu0 %v1538_v54 }
 0x3f2   :  { %1541 = vmatpush3.bf16.msra.mxu0 %v1538_v54  ;;  %v1554_v54 = vpack.c.bf16 %v1129_v53, %v1128_v52 }
 0x3f3   :  { %1543 = vmatprep.subr.bf16.mxu0 %v1542_v57 }
 0x3f6   :  { %1545 = vmatpush3.bf16.msra.mxu0 %v1542_v57 }
 0x3f7   :  { %1547 = vmatprep.subr.bf16.mxu0 %v1546_v15 }
 0x3fa   :  { %1549 = vmatpush3.bf16.msra.mxu0 %v1546_v15 }
 0x4c0   :  { %v1441_v22 = vpop.f32.mrb[6].mxu0 }
 0x4c1   :  { %v776_v23 = vadd.f32 %v1441_v22, %v1304_v21  ;;  %v770_v24 = vpop.f32.mrb[7].mxu0 }
 0x4c2   :  { %v771_v25 = vadd.f32 %v1304_v21, %v770_v24 }
 0x4c3   :  { %v780_v26 = vadd.f32 %v776_v23, %v1770_v13  ;;  %v1312_v23 = vld [vmem:[%s1980_s15] ss:$0 sm:$0xff] }
 0x4c4   :  { %v779_v27 = vadd.f32 %v771_v25, %v1761_v11  ;;  %v825_v11 = vld [vmem:[%s1977_s12] sm:$0xff] }
 0x4c5   :  { %v784_v28 = vsel %vm94_vm0, %v780_v26, 0.0  ;;  %v1526_v45 = vpack.c.bf16 %v826_v44, %v825_v11 }
 0x4c6   :  { %785 = vadd.xlane.f32.xlu1 %v784_v28  ;;  %v781_v29 = vsel %vm94_vm0, %v779_v27, 0.0 }
 0x4c7   :  { %782 = vadd.xlane.f32.xlu0 %v781_v29  ;;  %1527 = vmatprep.subr.bf16.mxu1 %v1526_v45 }
 0x4c8   :  { %1529 = vmatpush3.bf16.msra.mxu1 %v1526_v45 }
 0x4c9   :  { %1531 = vmatprep.subr.bf16.mxu1 %v1530_v48 }
 0x4cc   :  { %1533 = vmatpush3.bf16.msra.mxu1 %v1530_v48 }
 0x4cd   :  { %1550 = vmatprep.subr.bf16.mxu1 %v1611_v51 }
 0x553   :  { %v786_v30 = vpop.xlane.xlu1 %785 }
 0x554   :  { %v788_v36 = vmul.f32 0.03125, %v786_v30  ;;  %v783_v37 = vpop.xlane.xlu0 %782 }
 0x555   :  { %v787_v38 = vmul.f32 0.03125, %v783_v37  ;;  %v1065_v37 = vand.u32 127, %v506_v31 }
 0x556   :  { %v790_v39 = vsub.f32 %v780_v26, %v788_v36 }
 0x557   :  { %v789_v40 = vsub.f32 %v779_v27, %v787_v38  ;;  %vm1066_vm8 = vcmp.eq.s32.totalorder %v1820_v33, %v1065_v37 }
 0x558   :  { %v792_v41 = vmul.f32 %v790_v39, %v790_v39 }
 0x559   :  { %v791_v42 = vmul.f32 %v789_v40, %v789_v40 }
 0x55a   :  { %v796_v43 = vsel %vm94_vm0, %v792_v41, 0.0  ;;  %v1078_v41 = vrot.slane %v1826_v34, %v1829_v35 }
 0x55b   :  { %797 = vadd.xlane.f32.xlu1 %v796_v43  ;;  %v793_v13 = vsel %vm94_vm0, %v791_v42, 0.0  ;;  %v1317_v43 = vsel %vm1066_vm8, 1.0, %v1608_v14 }
 0x55c   :  { %794 = vadd.xlane.f32.xlu0 %v793_v13  ;;  %v1074_v13 = vrot.slane %v1817_v32, %v1829_v35  ;;  %v1082_v46 = vmul.f32 %v1317_v43, %v1078_v41  ;;  %v1126_v32 = vld [vmem:[%s1983_s18] sm:$0xff]  ;;  %v1127_v35 = vld [vmem:[%s1983_s18 + $0x8] sm:$0xff] }
 0x55d   :  { %v1551_v50 = vpack.c.bf16 %v1127_v35, %v1126_v32 }
 0x55e   :  { %v1081_v31 = vmul.f32 %v1317_v43, %v1074_v13  ;;  %v1086_v34 = vsel %vm518_vm5, %v1082_v46, 0.0 }
 0x560   :  { %v1083_v49 = vsel %vm518_vm5, %v1081_v31, 0.0 }
 0x5e8   :  { %v798_v58 = vpop.xlane.xlu1 %797 }
 0x5e9   :  { %v800_v59 = vmul.f32 0.03125, %v798_v58  ;;  %v795_v60 = vpop.xlane.xlu0 %794 }
 0x5ea   :  { %v799_v61 = vmul.f32 0.03125, %v795_v60 }
 0x5eb   :  { %v802_v62 = vadd.f32 1e-05, %v800_v59 }
 0x5ec   :  { %v801_v63 = vadd.f32 1e-05, %v799_v61 }
 0x5ed   :  { %1575 = vrsqrt.f32 %v802_v62  ;;  %v1315_v62 = vld [vmem:[%s1981_s16] ss:$0 sm:$0xff] }
 0x5ee   :  { %1577 = vrsqrt.f32 %v801_v63 }
 0x5f7   :  { %v1576_v0 = vpop.eup %1575 }
 0x5f8   :  { %v1578_v2 = vpop.eup %1577  ;;  %v806_v3 = vmul.f32 %v1576_v0, %v790_v39 }
 0x5f9   :  { %v805_v4 = vmul.f32 %v1578_v2, %v789_v40  ;;  %v1316_v2 = vld [vmem:[%s1982_s17] ss:$0 sm:$0xff] }
 0x5fa   :  { %v815_v5 = vmul.f32 %v1307_v1, %v806_v3 }
 0x5fb   :  { %v814_v7 = vmul.f32 %v1307_v1, %v805_v4 }
 0x5fc   :  { %v824_v9 = vadd.f32 %v1308_v6, %v815_v5 }
 0x5fd   :  { %v823_v8 = vadd.f32 %v1308_v6, %v814_v7 }
 0x5ff   :  { %1450 = vmatprep.mubr.msk.f32.mxu1 %vm94_vm0, %v823_v8 }
 0x600   :  { %1451 = vmatmul.mubr.msk.f32.vlgmr.msra.gmra.mrb[8].mxu1 %vm94_vm0, %v824_v9 }
 0x601   :  { %1480 = vmatprep.mubr.msk.f32.mxu1 %vm1609_vm1, %v1608_v14  ;;  %1552 = vmatpush3.bf16.msra.mxu1 %v1551_v50 }
 0x602   :  { %1553 = vmatprep.subr.bf16.mxu1 %v1611_v51 }
 0x605   :  { %1555 = vmatpush3.bf16.msra.mxu1 %v1554_v54 }
 0x606   :  { %1556 = vmatprep.subr.bf16.mxu1 %v1611_v51 }
 0x6d3   :  { %v1452_v17 = vpop.f32.mrb[8].mxu1 }
 0x6d4   :  { %v914_v18 = vadd.f32 %v1452_v17, %v1309_v16  ;;  %v908_v19 = vpop.f32.mrb[9].mxu1 }
 0x6d5   :  { %v909_v20 = vadd.f32 %v1309_v16, %v908_v19 }
 0x6d6   :  { %v918_v22 = vmax.f32 %v914_v18, 0.0 }
 0x6d7   :  { %v917_v21 = vmax.f32 %v909_v20, 0.0 }
 0x6d9   :  { %1469 = vmatprep.mubr.msk.f32.mxu0 %vm934_vm7, %v917_v21 }
 0x6da   :  { %1470 = vmatmul.mubr.msk.f32.vlgmr.msra.gmra.mrb[8].mxu0 %vm934_vm7, %v918_v22 }
 0x7ad   :  { %v1471_v24 = vpop.f32.mrb[8].mxu0 }
 0x7ae   :  { %v1013_v25 = vadd.f32 %v1471_v24, %v1312_v23  ;;  %v1007_v26 = vpop.f32.mrb[9].mxu0 }
 0x7af   :  { %v1008_v27 = vadd.f32 %v1312_v23, %v1007_v26 }
 0x7b0   :  { %v1017_v28 = vadd.f32 %v1013_v25, %v824_v9 }
 0x7b1   :  { %v1016_v29 = vadd.f32 %v1008_v27, %v823_v8 }
 0x7b2   :  { %v1021_v30 = vsel %vm94_vm0, %v1017_v28, 0.0 }
 0x7b3   :  { %1022 = vadd.xlane.f32.xlu1 %v1021_v30  ;;  %v1018_v36 = vsel %vm94_vm0, %v1016_v29, 0.0 }
 0x7b4   :  { %1019 = vadd.xlane.f32.xlu0 %v1018_v36 }
 0x840   :  { %v1023_v38 = vpop.xlane.xlu1 %1022 }
 0x841   :  { %v1025_v39 = vmul.f32 0.03125, %v1023_v38  ;;  %v1020_v40 = vpop.xlane.xlu0 %1019 }
 0x842   :  { %v1024_v42 = vmul.f32 0.03125, %v1020_v40 }
 0x843   :  { %v1027_v11 = vsub.f32 %v1017_v28, %v1025_v39  ;;  %v1130_v28 = vld [vmem:[%s1984_s19] sm:$0x1] }
 0x844   :  { %v1026_v44 = vsub.f32 %v1016_v29, %v1024_v42 }
 0x845   :  { %v1029_v45 = vmul.f32 %v1027_v11, %v1027_v11 }
 0x846   :  { %v1028_v47 = vmul.f32 %v1026_v44, %v1026_v44 }
 0x847   :  { %v1033_v33 = vsel %vm94_vm0, %v1029_v45, 0.0 }
 0x848   :  { %1034 = vadd.xlane.f32.xlu1 %v1033_v33  ;;  %v1030_v48 = vsel %vm94_vm0, %v1028_v47, 0.0 }
 0x849   :  { %1031 = vadd.xlane.f32.xlu0 %v1030_v48 }
 0x84c   :  { %1087 = vadd.xlane.f32.xlu1 %v1086_v34 }
 0x84d   :  { %1084 = vadd.xlane.f32.xlu0 %v1083_v49 }
 0x8d5   :  { %v1035_v55 = vpop.xlane.xlu1 %1034 }
 0x8d6   :  { %v1037_v56 = vmul.f32 0.03125, %v1035_v55  ;;  %v1032_v57 = vpop.xlane.xlu0 %1031 }
 0x8d7   :  { %v1036_v58 = vmul.f32 0.03125, %v1032_v57 }
 0x8d8   :  { %v1039_v59 = vadd.f32 1e-05, %v1037_v56 }
 0x8d9   :  { %v1038_v60 = vadd.f32 1e-05, %v1036_v58  ;;  %v1088_v1 = vpop.xlane.xlu1 %1087 }
 0x8da   :  { %1579 = vrsqrt.f32 %v1039_v59  ;;  %v1085_v4 = vpop.xlane.xlu0 %1084  ;;  %vm1090_vm9 = vcmp.gt.f32.partialorder %v1088_v1, 0.5 }
 0x8db   :  { %1581 = vrsqrt.f32 %v1038_v60  ;;  %vm1089_vm11 = vcmp.gt.f32.partialorder %v1085_v4, 0.5 }
 0x8e4   :  { %v1580_v61 = vpop.eup %1579 }
 0x8e5   :  { %v1582_v63 = vpop.eup %1581  ;;  %v1043_v0 = vmul.f32 %v1580_v61, %v1027_v11 }
 0x8e6   :  { %v1042_v3 = vmul.f32 %v1582_v63, %v1026_v44 }
 0x8e7   :  { %v1052_v5 = vmul.f32 %v1315_v62, %v1043_v0 }
 0x8e8   :  { %v1051_v6 = vmul.f32 %v1315_v62, %v1042_v3 }
 0x8e9   :  { %v1061_v7 = vadd.f32 %v1316_v2, %v1052_v5 }
 0x8ea   :  { %v1060_v8 = vadd.f32 %v1316_v2, %v1051_v6 }
 0x8eb   :  { %v1096_v9 = vsel %vm1090_vm9, 0.0, %v1061_v7  ;;  %v1101_v10 = vsel %vm1090_vm9, -1e+09, %v1061_v7 }
 0x8ec   :  { %1099 = vst.msk [vmem:[%s1985_s20] sm:$0xf0] %vm1097_vm10, %v1096_v9  ;;  %v1105_v12 = vrot.slane %v1101_v10, 4  ;;  %v1095_v15 = vsel %vm1089_vm11, 0.0, %v1060_v8  ;;  %v1100_v16 = vsel %vm1089_vm11, -1e+09, %v1060_v8 }
 0x8ed   :  { %1098 = vst.msk [vmem:[%s1985_s20 - $0x4] sm:$0xf0] %vm1097_vm10, %v1095_v15  ;;  %v1104_v17 = vrot.slane %v1100_v16, 4 }
 0x8ee   :  { %v1109_v18 = vmax.f32 %v1101_v10, %v1105_v12 }
 0x8ef   :  { %v1108_v19 = vmax.f32 %v1100_v16, %v1104_v17 }
 0x8f0   :  { %v1113_v21 = vrot.slane %v1109_v18, 2 }
 0x8f1   :  { %v1112_v20 = vrot.slane %v1108_v19, 2 }
 0x8f2   :  { %v1117_v24 = vmax.f32 %v1109_v18, %v1113_v21 }
 0x8f3   :  { %v1116_v22 = vmax.f32 %v1108_v19, %v1112_v20 }
 0x8f4   :  { %v1121_v26 = vrot.slane %v1117_v24, 1 }
 0x8f5   :  { %v1120_v23 = vrot.slane %v1116_v22, 1 }
 0x8f6   :  { %v1125_v27 = vmax.f32 %v1117_v24, %v1121_v26 }
 0x8f7   :  { %v1124_v25 = vmax.f32 %v1116_v22, %v1120_v23 }
 0x8f9   :  { %1481 = vmatmul.mubr.msk.f32.vlgmr.msra.gmra.mrb[10].mxu1 %vm94_vm0, %v1124_v25 }
 0x8fa   :  { %1558 = vmatpush3.bf16.msra.mxu1 %v1551_v50  ;;  %1491 = vmatprep.mubr.msk.f32.mxu1 %vm1609_vm1, %v1608_v14 }
 0x8fb   :  { %1559 = vmatprep.subr.bf16.mxu1 %v1611_v51 }
 0x8fe   :  { %1561 = vmatpush3.bf16.msra.mxu1 %v1554_v54 }
 0x901   :  { %1492 = vmatmul.mubr.msk.f32.vlgmr.msra.gmra.mrb[12].mxu1 %vm94_vm0, %v1125_v27 }
 0x9cc   :  { %v1200_v29 = vpop.f32.mrb[10].mxu1 }
 0x9cd   :  { %v1201_v30 = vadd.f32 %v1200_v29, %v1130_v28  ;;  %v1482_v36 = vpop.f32.mrb[11].mxu1 }
 0x9cf   :  { %1278 = vst.msk [vmem:[%s1986_s21] sm:$0x1] %vm1277_vm12, %v1201_v30 }
 0x9d4   :  { %v1273_v37 = vpop.f32.mrb[12].mxu1 }
 0x9d5   :  { %v1274_v14 = vadd.f32 %v1273_v37, %v1130_v28  ;;  %v1493_v38 = vpop.f32.mrb[13].mxu1 }
 0x9d7   :  { %1279 = vst.msk [vmem:[%s1986_s21 + $0x1] sm:$0x1] %vm1277_vm12, %v1274_v14 }
 0x9d8   :  { %1288 = vsyncpa [#allocation3], 1 }

</bundles_post_ra>
